<compile_context>
chip_gen: v6e
topology: v6e:2x2x1
jax: 0.10.0
libtpu: 0.0.40
codegen_flags: <defaults>
</compile_context>

<pallas_src>
import math

import jax
import jax.numpy as jnp
from jax.experimental import pallas as pl
from jax.experimental.pallas import tpu as pltpu


def _round_up(x, m):
    return ((x + m - 1) // m) * m


def _clf_matmul_kernel_f32out(labels_ref, weight_ref, out_ref):
    """K-step of out += labels @ weight, accumulating directly into the f32
    output block (resident across the K axis, so no extra scratch needed)."""
    k = pl.program_id(2)

    @pl.when(k == 0)
    def _():
        out_ref[...] = jnp.zeros_like(out_ref)

    out_ref[...] += jnp.dot(
        labels_ref[...], weight_ref[...], preferred_element_type=jnp.float32
    )


def _clf_matmul_kernel_acc(labels_ref, weight_ref, out_ref, acc_ref):
    """K-step with an explicit f32 VMEM accumulator (used when the output
    dtype is bf16 or lower)."""
    k = pl.program_id(2)

    @pl.when(k == 0)
    def _():
        acc_ref[...] = jnp.zeros_like(acc_ref)

    acc_ref[...] += jnp.dot(
        labels_ref[...], weight_ref[...], preferred_element_type=jnp.float32
    )

    @pl.when(k == pl.num_programs(2) - 1)
    def _():
        out_ref[...] = acc_ref[...].astype(out_ref.dtype)


def label_fts_get_clf(labels, weight, *, tm=256, tn=512, tk=512,
                      compute_dtype=None):
    """Pallas implementation of LabelFts._get_clf: labels.mm(weight).

    labels: (L, F), weight: (F, D) -> (L, D).  Output dtype matches the
    original labels dtype (torch.mm semantics); `compute_dtype` optionally
    casts the streamed operands (e.g. bf16) while keeping f32 accumulation.
    """
    L, F = labels.shape
    F2, D = weight.shape
    assert F == F2, "label_features mismatch between labels and weight"

    out_dtype = labels.dtype
    if compute_dtype is not None:
        labels = labels.astype(compute_dtype)
        weight = weight.astype(compute_dtype)

    # Clamp tiles to the (aligned) problem size; keep (8, 128) alignment.
    tm = min(tm, _round_up(L, 8))
    tn = min(tn, _round_up(D, 128))
    tk = min(tk, _round_up(F, 128))

    # Zero-pad to tile multiples (zero K contributes nothing; padded M/N rows
    # and columns are cropped after the call).
    Lp, Dp, Fp = _round_up(L, tm), _round_up(D, tn), _round_up(F, tk)
    if (Lp, Fp) != (L, F):
        labels = jnp.pad(labels, ((0, Lp - L), (0, Fp - F)))
    if (Fp, Dp) != (F, D):
        weight = jnp.pad(weight, ((0, Fp - F), (0, Dp - D)))

    grid = (Lp // tm, Dp // tn, Fp // tk)

    use_acc_scratch = jnp.dtype(out_dtype) != jnp.dtype(jnp.float32)
    kernel = _clf_matmul_kernel_acc if use_acc_scratch else _clf_matmul_kernel_f32out
    scratch_shapes = (
        [pltpu.VMEM((tm, tn), jnp.float32)] if use_acc_scratch else []
    )

    # Explicit VMEM budget: double-buffered inputs + output (+ accumulator),
    # with headroom, capped well below v7x's 64 MiB physical VMEM.
    in_itemsize = jnp.dtype(labels.dtype).itemsize
    out_itemsize = jnp.dtype(out_dtype).itemsize
    needed = (2 * (tm * tk + tk * tn) * in_itemsize
              + 2 * tm * tn * out_itemsize
              + (tm * tn * 4 if use_acc_scratch else 0))
    vmem_limit = int(min(max(2 * needed, 32 * 1024 * 1024), 48 * 1024 * 1024))

    cost = pl.CostEstimate(
        flops=2 * Lp * Fp * Dp,
        transcendentals=0,
        bytes_accessed=(Lp * Fp * in_itemsize
                        + Fp * Dp * in_itemsize
                        + Lp * Dp * out_itemsize),
    )

    out_padded = pl.pallas_call(
        kernel,
        out_shape=jax.ShapeDtypeStruct((Lp, Dp), out_dtype),
        grid_spec=pltpu.PrefetchScalarGridSpec(
            num_scalar_prefetch=0,
            grid=grid,
            in_specs=[
                pl.BlockSpec((tm, tk), lambda i, j, k: (i, k)),   # labels tile
                pl.BlockSpec((tk, tn), lambda i, j, k: (k, j)),   # weight tile
            ],
            out_specs=pl.BlockSpec((tm, tn), lambda i, j, k: (i, j)),
            scratch_shapes=scratch_shapes,
        ),
        compiler_params=pltpu.CompilerParams(
            dimension_semantics=("parallel", "parallel", "arbitrary"),
            vmem_limit_bytes=vmem_limit,
        ),
        cost_estimate=cost,
    )(labels, weight)

    if (Lp, Dp) != (L, D):
        out_padded = out_padded[:L, :D]
    return out_padded


def label_fts_forward(labels, weight, *, compute_dtype=None):
    """LabelFts.forward with default flags: Rpp(labels @ weight)."""
    lbl_clf = label_fts_get_clf(labels, weight, compute_dtype=compute_dtype)
    # Rpp (transform) — identity, see TODO(synk) above.
    return lbl_clf


if __name__ == "__main__":
    # Module hyperparameters (small, synthetic; deliberately NOT multiples of
    # the tile / (8, 128) minimums to exercise the padding path).
    input_size = 128       # D: label-embedding dimension
    label_features = 200   # F: number of tokens in label text / feature vocab
    num_labels = 12        # L: number of labels in this batch

    key = jax.random.PRNGKey(0)
    k_lab, k_w = jax.random.split(key)

    # labels: a (typically sparse) label-by-feature matrix; dense here.
    labels = jax.random.uniform(
        k_lab, (num_labels, label_features), dtype=jnp.float32
    )

    # Deterministic init matching LabelFts.reset_parameters():
    #   weight ~ Uniform(-stdv, stdv), stdv = 1/sqrt(input_size)
    stdv = 1.0 / math.sqrt(input_size)
    weight = jax.random.uniform(
        k_w, (label_features, input_size), dtype=jnp.float32,
        minval=-stdv, maxval=stdv,
    )

    # Plain-JAX reference (torch.mm equivalent).
    ref = labels @ weight

    # 1) f32 path — exact vs the reference.
    out_f32 = jax.block_until_ready(label_fts_forward(labels, weight))
    assert out_f32.shape == (num_labels, input_size)
    assert jnp.allclose(out_f32, ref, atol=1e-5, rtol=1e-5)

    # 2) bf16 compute path (halved HBM weight stream, f32 accumulation).
    out_bf16 = jax.block_until_ready(
        label_fts_forward(labels, weight, compute_dtype=jnp.bfloat16)
    )
    assert out_bf16.shape == (num_labels, input_size)
    assert out_bf16.dtype == jnp.float32
    assert jnp.allclose(out_bf16, ref, atol=2e-2, rtol=2e-2)

    print("KERNEL_OK")
</pallas_src>

<mosaic_0001>
module attributes {stable_mosaic.version = 11 : i64} {
  func.func @_clf_matmul_kernel_f32out(%arg0: i32, %arg1: i32, %arg2: i32, %arg3: memref<16x256xf32, #tpu.memory_space<vmem>>, %arg4: memref<256x128xf32, #tpu.memory_space<vmem>>, %arg5: memref<16x128xf32, #tpu.memory_space<vmem>>) attributes {dimension_semantics = [#tpu.dimension_semantics<parallel>, #tpu.dimension_semantics<parallel>, #tpu.dimension_semantics<arbitrary>], iteration_bounds = array<i64: 1, 1, 1>, scalar_prefetch = 0 : i64, scratch_operands = 0 : i64, tpu.core_type = #tpu.core_type<tc>, window_params = [{transform_indices = @transform_0, window_bounds = array<i64: 16, 256>}, {transform_indices = @transform_1, window_bounds = array<i64: 256, 128>}, {transform_indices = @transform_2, window_bounds = array<i64: 16, 128>}]} {
    %c0_i32 = arith.constant 0 : i32
    %0 = arith.cmpi eq, %arg2, %c0_i32 : i32
    %1 = arith.extui %0 : i1 to i32
    %c0_i32_0 = arith.constant 0 : i32
    %2 = arith.cmpi ne, %1, %c0_i32_0 : i32
    scf.if %2 {
      %cst_8 = arith.constant 0.000000e+00 : f32
      %9 = vector.broadcast %cst_8 : f32 to vector<16x128xf32>
      %c0_9 = arith.constant 0 : index
      %c0_10 = arith.constant 0 : index
      %10 = vector.load %arg5[%c0_9, %c0_10] : memref<16x128xf32, #tpu.memory_space<vmem>>, vector<16x128xf32>
      tpu.vector_store %arg5[%c0_9, %c0_10], %9 {strides = array<i32>} : memref<16x128xf32, #tpu.memory_space<vmem>>, vector<16x128xf32>,
    } else {
    }
    %c0 = arith.constant 0 : index
    %c0_1 = arith.constant 0 : index
    %3 = vector.load %arg5[%c0, %c0_1] : memref<16x128xf32, #tpu.memory_space<vmem>>, vector<16x128xf32>
    %c0_2 = arith.constant 0 : index
    %c0_3 = arith.constant 0 : index
    %4 = vector.load %arg3[%c0_2, %c0_3] : memref<16x256xf32, #tpu.memory_space<vmem>>, vector<16x256xf32>
    %c0_4 = arith.constant 0 : index
    %c0_5 = arith.constant 0 : index
    %5 = vector.load %arg4[%c0_4, %c0_5] : memref<256x128xf32, #tpu.memory_space<vmem>>, vector<256x128xf32>
    %cst = arith.constant dense<0.000000e+00> : vector<16x128xf32>
    %6 = tpu.matmul %4, %5, %cst {dimension_numbers = #tpu.dot_dimension_numbers<[1], [0], [0], [1], [0, 0, 1, 1], [], []>} : vector<16x256xf32>, vector<256x128xf32>, vector<16x128xf32> -> vector<16x128xf32>
    %7 = arith.addf %3, %6 : vector<16x128xf32>
    %c0_6 = arith.constant 0 : index
    %c0_7 = arith.constant 0 : index
    %8 = vector.load %arg5[%c0_6, %c0_7] : memref<16x128xf32, #tpu.memory_space<vmem>>, vector<16x128xf32>
    tpu.vector_store %arg5[%c0_6, %c0_7], %7 {strides = array<i32>} : memref<16x128xf32, #tpu.memory_space<vmem>>, vector<16x128xf32>,
    return
  }
  func.func @transform_0(%arg0: i32, %arg1: i32, %arg2: i32) -> (i32, i32) {
    %c0_i32 = arith.constant 0 : i32
    return %arg0, %arg2 : i32, i32
  }
  func.func @transform_1(%arg0: i32, %arg1: i32, %arg2: i32) -> (i32, i32) {
    %c0_i32 = arith.constant 0 : i32
    return %arg2, %arg1 : i32, i32
  }
  func.func @transform_2(%arg0: i32, %arg1: i32, %arg2: i32) -> (i32, i32) {
    %c0_i32 = arith.constant 0 : i32
    return %arg0, %arg1 : i32, i32
  }
}

</mosaic_0001>

<bundles_post_ra>
// kernel: tpu_custom_call.1
= control target key start
LH: loop header
LB: loop body
LE: loop exit
PB: predicated region body
PF: predicated region fallthrough
CT: control target
= control target key end

     0   :  { %7 = vsyncpa [#allocation3], 0  ;;  %s362_s0 = inlined_call_operand.hbm [shape: f32[16,256], index: 0, kind: input, shape index: {}]   ;;  %s363_s1 = inlined_call_operand.hbm [shape: f32[256,128], index: 1, kind: input, shape index: {}]   ;;  %s364_s2 = inlined_call_operand.hbm [shape: f32[16,128], index: 2, kind: output, shape index: {}]  }
   0x1   :  { %8 = vsyncpa [#allocation6], 0 }
   0x2   :  { %9 = vsyncpa [#allocation4], 0  ;;  %s325_s9 = smov [#allocation2]  }
   0x3   :  { %s15_s10 = sshll.u32 %s325_s9, 4  ;;  %s16_s10 = int_to_ptr.vmem [resolvable:$true] %s15_s10 }
   0x4   :  { %s267_s11 = scalar_lea.vmem %s16_s10, 512  ;;  %p272_p1 = scmp.lt.s32.totalorder %s16_s10, %s16_s10 }
   0x5   :  { %p268_p0 = scmp.ne.s32.totalorder %s16_s10, %s267_s11  ;;  %p273_p2 = scmp.lt.s32.totalorder %s267_s11, %s267_s11 }
   0x7   :  { %p274_p3 = por %p273_p2, %p272_p1 }
   0x9   :  { %p275_p4 = pnand %p274_p3, %p268_p0 }
   0xb   :  { %278 = shalt.err (!%p275_p4)
}
   0xc   :  { %s326_s12 = smov 256   ;;  %s327_s13 = smov 16  }
   0xd   :  { %21 = dma.hbm_to_vmem [thread:$0]  %s362_s0, 512, %s16_s10, [#allocation3], %s326_s12, %s326_s12, %s327_s13  }
   0xe   :  { %s328_s16 = smov [#allocation5]  }
   0xf   :  { %s27_s17 = sshll.u32 %s328_s16, 4  ;;  %s28_s17 = int_to_ptr.vmem [resolvable:$true] %s27_s17 }
  0x10   :  { %s287_s18 = scalar_lea.vmem %s28_s17, 4096  ;;  %p292_p6 = scmp.lt.s32.totalorder %s28_s17, %s28_s17 }
  0x11   :  { %p288_p5 = scmp.ne.s32.totalorder %s28_s17, %s287_s18  ;;  %p293_p7 = scmp.lt.s32.totalorder %s287_s18, %s287_s18 }
  0x13   :  { %p294_p8 = por %p293_p7, %p292_p6 }
  0x15   :  { %p295_p9 = pnand %p294_p8, %p288_p5 }
  0x17   :  { %298 = shalt.err (!%p295_p9)
}
  0x18   :  { %s329_s19 = smov 128   ;;  %s330_s20 = smov 8  }
  0x19   :  { %33 = dma.hbm_to_vmem [thread:$0]  %s363_s1, 4096, %s28_s17, [#allocation6], %s329_s19, %s329_s19, %s330_s20  }
  0x1a   :  { %319 = dma.done.wait [#allocation3], 512  }
  0x1b   :  { %320 = vsyncadd [#allocation3], 4294966784 }
  0x1c   :  { %321 = dma.done.wait [#allocation6], 4096  }
  0x1d   :  { %322 = vsyncadd [#allocation6], 4294963200  ;;  %v83_v0 = vld [vmem:[#allocation5 + $0xf8] sm:$0xff]  ;;  %v82_v2 = vld [vmem:[#allocation5 + $0xf0] sm:$0xff]  ;;  %s331_s0 = smov [#allocation7]  }
  0x1e   :  { %v67_v1 = vld [vmem:[#allocation5 + $0x78] sm:$0xff]  ;;  %181 = vmatprep.subr.mxu0 %v83_v0  ;;  %219 = vmatprep.subr.mxu1 %v83_v0  ;;  %v66_v3 = vld [vmem:[#allocation5 + $0x70] sm:$0xff]  ;;  %v81_v4 = vld [vmem:[#allocation5 + $0xe8] sm:$0xff]  ;;  %s168_s1 = sshll.u32 %s331_s0, 4  ;;  %s169_s1 = int_to_ptr.vmem [resolvable:$true] %s168_s1 }
  0x1f   :  { %182 = vmatpush3.msra.mxu0 %v67_v1  ;;  %235 = vmatpush3.msra.mxu1 %v67_v1  ;;  %v65_v5 = vld [vmem:[#allocation5 + $0x68] sm:$0xff]  ;;  %v80_v6 = vld [vmem:[#allocation5 + $0xe0] sm:$0xff]  ;;  %v79_v8 = vld [vmem:[#allocation5 + $0xd8] sm:$0xff]  ;;  %s299_s23 = scalar_lea.vmem %s169_s1, 256  ;;  %p304_p11 = scmp.lt.s32.totalorder %s169_s1, %s169_s1 }
  0x20   :  { %183 = vmatprep.subr.mxu0 %v82_v2  ;;  %220 = vmatprep.subr.mxu1 %v82_v2  ;;  %v64_v7 = vld [vmem:[#allocation5 + $0x60] sm:$0xff]  ;;  %v63_v9 = vld [vmem:[#allocation5 + $0x58] sm:$0xff]  ;;  %v78_v10 = vld [vmem:[#allocation5 + $0xd0] sm:$0xff]  ;;  %p300_p10 = scmp.ne.s32.totalorder %s169_s1, %s299_s23  ;;  %p305_p12 = scmp.lt.s32.totalorder %s299_s23, %s299_s23 }
  0x21   :  { %184 = vmatpush3.msra.mxu0 %v66_v3  ;;  %236 = vmatpush3.msra.mxu1 %v66_v3  ;;  %v62_v11 = vld [vmem:[#allocation5 + $0x50] sm:$0xff]  ;;  %v77_v12 = vld [vmem:[#allocation5 + $0xc8] sm:$0xff]  ;;  %v76_v14 = vld [vmem:[#allocation5 + $0xc0] sm:$0xff] }
  0x22   :  { %185 = vmatprep.subr.mxu0 %v81_v4  ;;  %221 = vmatprep.subr.mxu1 %v81_v4  ;;  %v61_v13 = vld [vmem:[#allocation5 + $0x48] sm:$0xff]  ;;  %v60_v15 = vld [vmem:[#allocation5 + $0x40] sm:$0xff]  ;;  %v75_v16 = vld [vmem:[#allocation5 + $0xb8] sm:$0xff]  ;;  %p306_p13 = por %p305_p12, %p304_p11 }
  0x23   :  { %186 = vmatpush3.msra.mxu0 %v65_v5  ;;  %237 = vmatpush3.msra.mxu1 %v65_v5  ;;  %v59_v17 = vld [vmem:[#allocation5 + $0x38] sm:$0xff]  ;;  %v74_v18 = vld [vmem:[#allocation5 + $0xb0] sm:$0xff]  ;;  %v73_v20 = vld [vmem:[#allocation5 + $0xa8] sm:$0xff] }
  0x24   :  { %187 = vmatprep.subr.mxu0 %v80_v6  ;;  %222 = vmatprep.subr.mxu1 %v80_v6  ;;  %v58_v19 = vld [vmem:[#allocation5 + $0x30] sm:$0xff]  ;;  %v57_v21 = vld [vmem:[#allocation5 + $0x28] sm:$0xff]  ;;  %v72_v22 = vld [vmem:[#allocation5 + $0xa0] sm:$0xff]  ;;  %p307_p0 = pnand %p306_p13, %p300_p10 }
  0x25   :  { %188 = vmatpush3.msra.mxu0 %v64_v7  ;;  %238 = vmatpush3.msra.mxu1 %v64_v7  ;;  %v56_v23 = vld [vmem:[#allocation5 + $0x20] sm:$0xff]  ;;  %v71_v24 = vld [vmem:[#allocation5 + $0x98] sm:$0xff]  ;;  %v70_v26 = vld [vmem:[#allocation5 + $0x90] sm:$0xff] }
  0x26   :  { %189 = vmatprep.subr.mxu0 %v79_v8  ;;  %223 = vmatprep.subr.mxu1 %v79_v8  ;;  %v55_v25 = vld [vmem:[#allocation5 + $0x18] sm:$0xff]  ;;  %v54_v27 = vld [vmem:[#allocation5 + $0x10] sm:$0xff]  ;;  %v69_v28 = vld [vmem:[#allocation5 + $0x88] sm:$0xff] }
  0x27   :  { %190 = vmatpush3.msra.mxu0 %v63_v9  ;;  %239 = vmatpush3.msra.mxu1 %v63_v9  ;;  %v53_v29 = vld [vmem:[#allocation5 + $0x8] sm:$0xff]  ;;  %v68_v30 = vld [vmem:[#allocation5 + $0x80] sm:$0xff]  ;;  %v51_v33 = vld [vmem:[#allocation2 + $0x18] sm:$0xff] }
  0x28   :  { %191 = vmatprep.subr.mxu0 %v78_v10  ;;  %224 = vmatprep.subr.mxu1 %v78_v10  ;;  %v52_v31 = vld [vmem:[#allocation5] sm:$0xff]  ;;  %v49_v32 = vld [vmem:[#allocation2 + $0x8] sm:$0xff]  ;;  %v50_v35 = vld [vmem:[#allocation2 + $0x10] sm:$0xff] }
  0x29   :  { %192 = vmatpush3.msra.mxu0 %v62_v11  ;;  %240 = vmatpush3.msra.mxu1 %v62_v11  ;;  %v48_v34 = vld [vmem:[#allocation2] sm:$0xff] }
  0x2a   :  { %193 = vmatprep.subr.mxu0 %v77_v12  ;;  %225 = vmatprep.subr.mxu1 %v77_v12 }
  0x2b   :  { %194 = vmatpush3.msra.mxu0 %v61_v13  ;;  %241 = vmatpush3.msra.mxu1 %v61_v13 }
  0x2c   :  { %195 = vmatprep.subr.mxu0 %v76_v14  ;;  %226 = vmatprep.subr.mxu1 %v76_v14 }
  0x2d   :  { %196 = vmatpush3.msra.mxu0 %v60_v15  ;;  %242 = vmatpush3.msra.mxu1 %v60_v15 }
  0x2e   :  { %197 = vmatprep.subr.mxu0 %v75_v16  ;;  %227 = vmatprep.subr.mxu1 %v75_v16 }
  0x2f   :  { %198 = vmatpush3.msra.mxu0 %v59_v17  ;;  %243 = vmatpush3.msra.mxu1 %v59_v17 }
  0x30   :  { %199 = vmatprep.subr.mxu0 %v74_v18  ;;  %228 = vmatprep.subr.mxu1 %v74_v18 }
  0x31   :  { %200 = vmatpush3.msra.mxu0 %v58_v19  ;;  %244 = vmatpush3.msra.mxu1 %v58_v19 }
  0x32   :  { %201 = vmatprep.subr.mxu0 %v73_v20  ;;  %229 = vmatprep.subr.mxu1 %v73_v20 }
  0x33   :  { %202 = vmatpush3.msra.mxu0 %v57_v21  ;;  %245 = vmatpush3.msra.mxu1 %v57_v21 }
  0x34   :  { %203 = vmatprep.subr.mxu0 %v72_v22  ;;  %230 = vmatprep.subr.mxu1 %v72_v22 }
  0x35   :  { %204 = vmatpush3.msra.mxu0 %v56_v23  ;;  %246 = vmatpush3.msra.mxu1 %v56_v23 }
  0x36   :  { %205 = vmatprep.subr.mxu0 %v71_v24  ;;  %231 = vmatprep.subr.mxu1 %v71_v24 }
  0x37   :  { %206 = vmatpush3.msra.mxu0 %v55_v25  ;;  %247 = vmatpush3.msra.mxu1 %v55_v25 }
  0x38   :  { %207 = vmatprep.subr.mxu0 %v70_v26  ;;  %232 = vmatprep.subr.mxu1 %v70_v26 }
  0x39   :  { %208 = vmatpush3.msra.mxu0 %v54_v27  ;;  %248 = vmatpush3.msra.mxu1 %v54_v27 }
  0x3a   :  { %209 = vmatprep.subr.mxu0 %v69_v28  ;;  %233 = vmatprep.subr.mxu1 %v69_v28 }
  0x3b   :  { %210 = vmatpush3.msra.mxu0 %v53_v29  ;;  %249 = vmatpush3.msra.mxu1 %v53_v29 }
  0x3c   :  { %211 = vmatprep.subr.mxu0 %v68_v30  ;;  %234 = vmatprep.subr.mxu1 %v68_v30 }
  0x3d   :  { %212 = vmatpush3.msra.mxu0 %v52_v31  ;;  %250 = vmatpush3.msra.mxu1 %v52_v31 }
  0x3e   :  { %148 = vmatprep.mubr.f32.mxu0 %v49_v32  ;;  %153 = vmatprep.mubr.f32.mxu1 %v51_v33 }
  0x3f   :  { %149 = vmatmul.mubr.f32.vlgmr.msra.gmra.mxu0 %v48_v34  ;;  %154 = vmatmul.mubr.f32.vlgmr.msra.gmra.mxu1 %v50_v35 }
  0xff   :  { %v213_v36 = vpop.f32.mrf.mxu0  ;;  %v216_v37 = vpop.f32.mrf.mxu1 }
 0x101   :  { %v214_v38 = vpop.f32.mrf.mxu0  ;;  %v217_v39 = vpop.f32.mrf.mxu1 }
 0x102   :  { %v215_v40 = vadd.f32 %v214_v38, %v213_v36  ;;  %v218_v41 = vadd.f32 %v217_v39, %v216_v37 }
 0x104   :  { %161 = vst [vmem:[#allocation7] sm:$0xff] %v215_v40  ;;  %162 = vst [vmem:[#allocation7 + $0x8] sm:$0xff] %v218_v41 }
 0x105   :  { %310 = shalt.err (!%p307_p0)
}
 0x106   :  { %174 = dma.vmem_to_hbm [thread:$0]  %s169_s1, 256, %s364_s2, [#allocation4], %s329_s19, %s329_s19, %s330_s20  }
 0x107   :  { %323 = dma.done.wait [#allocation4], 256  }
 0x108   :  { %324 = vsyncadd [#allocation4], 4294967040 }
 0x109   :  { %178 = vsyncpa [#allocation3], 1 }
 0x10a   :  { %179 = vsyncpa [#allocation6], 1 }
 0x10b   :  { %180 = vsyncpa [#allocation4], 1 }

</bundles_post_ra>
